<compile_context>
chip_gen: v6e
topology: v6e:2x2x1
jax: 0.10.0
libtpu: 0.0.40
codegen_flags: <defaults>
</compile_context>

<pallas_src>
import functools

import jax
import jax.numpy as jnp
import numpy as np
from jax.experimental import pallas as pl
from jax.experimental.pallas import tpu as pltpu

LANE = 128
SUBLANE = 8
TILE_N_CAP = 2048


def _round_up(x, m):
    return (x + m - 1) // m * m


def _mxu_align():
    """256 on parts with a 256x256 MXU (v6e / v7x), 128 on v5e and older."""
    try:
        kind = jax.devices()[0].device_kind.lower()
    except Exception:
        return 128
    if any(tag in kind for tag in ("v2", "v3", "v4", "v5")):
        return 128
    return 256


# -----------------------------------------------------------------------------
# Synthetic feature-column definitions (stand-ins for SparseFeat / DenseFeat).
# -----------------------------------------------------------------------------
class SparseFeat:
    def __init__(self, name, vocabulary_size, embedding_dim):
        self.name = name
        self.embedding_name = name
        self.vocabulary_size = vocabulary_size
        self.embedding_dim = embedding_dim


class DenseFeat:
    def __init__(self, name, dimension):
        self.name = name
        self.dimension = dimension


# -----------------------------------------------------------------------------
# Pallas kernel: fused DCN (CrossNet + DNN), one row-tile per grid step.
# -----------------------------------------------------------------------------
def _dcn_kernel(num_dnn_layers, num_cross_layers, d_pad, *refs):
    # refs layout:
    #   x_ref                               (tile_n, D_pad)              f32
    #   (W_i, b_i) * num_dnn_layers         W_i (in_pad, out_pad) bf16,
    #                                       b_i (1, out_pad)      f32
    #   (ck_i, cb_i) * num_cross_layers     (1, D_pad)                   f32
    #   out_ref                             (tile_n, D_pad + H_last_pad) f32
    #                                       columns [0, D_pad) = cross,
    #                                       columns [D_pad, :)  = deep
    x_ref = refs[0]
    idx = 1
    dnn_params = []
    for _ in range(num_dnn_layers):
        dnn_params.append((refs[idx], refs[idx + 1]))
        idx += 2
    cross_params = []
    for _ in range(num_cross_layers):
        cross_params.append((refs[idx], refs[idx + 1]))
        idx += 2
    out_ref = refs[idx]

    x = x_ref[...]  # f32, read once per grid step

    # --- DNN tower (MXU): bf16 operands, f32 accumulation, f32 bias/ReLU ---
    # Static Python loop => fully unrolled; LLO interleaves MXU pushes with the
    # previous layer's bias/ReLU VPU work.  Activations are narrowed to bf16
    # right after each ReLU (they feed the next matmul as bf16 anyway) so live
    # f32 tiles stay small; the last layer stays f32 for the store.
    h = x.astype(jnp.bfloat16)
    last = num_dnn_layers - 1
    for li, (w_ref, b_ref) in enumerate(dnn_params):
        acc = jnp.dot(h, w_ref[...], preferred_element_type=jnp.float32)
        act = jnp.maximum(acc + b_ref[...], 0.0)
        h = act if li == last else act.astype(jnp.bfloat16)

    # --- CrossNet (VPU multiply + XLU lane reduce; keeps the MXU free) ---
    # x_{l+1} = x_0 * <x_l, k_l> + b_l + x_l
    x0 = x
    xl = x
    for (ck_ref, cb_ref) in cross_params:
        xl_w = jnp.sum(xl * ck_ref[...], axis=-1, keepdims=True)  # (tile_n, 1)
        xl = x0 * xl_w + cb_ref[...] + xl

    # --- single fused, lane-dense full-block stores: [cross | deep] ---
    out_ref[:, :d_pad] = xl.astype(out_ref.dtype)
    out_ref[:, d_pad:] = h.astype(out_ref.dtype)


def _select_tile_n(n_rows, d_pad, hid_pad, weight_bytes, vmem_cap):
    """Largest power-of-two row tile that fits the VMEM budget, with bounded
    row-padding waste and a grid of >= 2 steps when there are enough rows."""
    h_last_pad = hid_pad[-1]
    max_hid = max(hid_pad)
    # f32 VMEM bytes that scale with tile_n:
    #   x (double-buffered) + fused output (double-buffered) + live temporaries
    per_row = 4 * (2 * d_pad
                   + 2 * (d_pad + h_last_pad)
                   + 3 * d_pad + 2 * max_hid)
    budget = int(0.55 * vmem_cap) - weight_bytes - (2 << 20)
    tile = budget // per_row if budget > 0 else SUBLANE
    tile = int(max(SUBLANE, min(TILE_N_CAP, tile)))
    tile = 1 << int(np.floor(np.log2(tile)))  # power of two
    # don't tile far past the actual row count
    rows_p2 = 1 << int(np.ceil(np.log2(max(_round_up(n_rows, SUBLANE), SUBLANE))))
    tile = min(tile, rows_p2)
    # keep row-padding waste bounded (<= ~25% of n_rows): avoids ~2x overwork
    # when N sits just above a big tile multiple (e.g. N=520 with tile 512)
    while tile > SUBLANE and (_round_up(n_rows, tile) - n_rows) > max(n_rows // 4, SUBLANE):
        tile //= 2
    # make sure the parallel grid has at least 2 steps (both TCs on v7x)
    if _round_up(n_rows, tile) // tile < 2 and n_rows > SUBLANE:
        tile = max(SUBLANE, tile // 2)
    return tile


def dcn_forward_pallas(dnn_input, dnn_weights, dnn_biases, cross_kernels, cross_biases):
    """dnn_input: (N, D) float32.  Returns (N, D + hidden_units[-1]) float32."""
    n_rows, in_dim = dnn_input.shape
    h_last = dnn_weights[-1].shape[1]

    mxu = _mxu_align()
    d_pad = _round_up(in_dim, LANE)
    # Hidden (MXU output / contraction) dims: 256-aligned on 256x256-MXU parts,
    # 128-aligned otherwise or when the natural dim is small.
    hid_pad = [_round_up(w.shape[1], LANE if w.shape[1] <= LANE else mxu)
               for w in dnn_weights]
    h_last_pad = hid_pad[-1]
    in_dims = [d_pad] + hid_pad[:-1]

    # VMEM-resident (single-buffered) parameter footprint.
    weight_bytes = 0
    for li in range(len(dnn_weights)):
        weight_bytes += in_dims[li] * hid_pad[li] * 2      # bf16 weight tile
        weight_bytes += SUBLANE * hid_pad[li] * 4          # padded f32 bias tile
    weight_bytes += len(cross_kernels) * 2 * SUBLANE * d_pad * 4

    try:
        vmem_cap = int(getattr(pltpu.get_tpu_info(), "vmem_capacity_bytes", 64 << 20))
    except Exception:  # defensive: fall back to the smallest (v7x) capacity
        vmem_cap = 64 << 20

    tile_n = _select_tile_n(n_rows, d_pad, hid_pad, weight_bytes, vmem_cap)
    n_pad = _round_up(n_rows, tile_n)

    x_p = jnp.pad(dnn_input.astype(jnp.float32),
                  ((0, n_pad - n_rows), (0, d_pad - in_dim)))
    # TODO(synk): for in_dim << 128 the lane padding of x (and of the cross half
    # of the output) inflates HBM traffic ~d_pad/in_dim; keeping x at its
    # natural width in HBM (full-dim block) and padding only inside VMEM would
    # remove that tax for tiny-feature configs.

    operands = [x_p]
    in_specs = [pl.BlockSpec((tile_n, d_pad), lambda i: (i, 0))]

    resident = pl.Buffered(1)  # grid-invariant operands: no double buffering
    for li, (w, b) in enumerate(zip(dnn_weights, dnn_biases)):
        w_p = jnp.pad(w.astype(jnp.float32),
                      ((0, in_dims[li] - w.shape[0]), (0, hid_pad[li] - w.shape[1])))
        b_p = jnp.pad(b.astype(jnp.float32).reshape(1, -1),
                      ((0, 0), (0, hid_pad[li] - b.shape[0])))
        operands += [w_p.astype(jnp.bfloat16), b_p]
        in_specs += [pl.BlockSpec(w_p.shape, lambda i: (0, 0), pipeline_mode=resident),
                     pl.BlockSpec(b_p.shape, lambda i: (0, 0), pipeline_mode=resident)]
    # TODO(synk): on v7x the tower weights could be stored in fp8 to halve the
    # weight VMEM/DMA footprint (needs an accuracy evaluation); kept bf16 here.

    for k, b in zip(cross_kernels, cross_biases):
        k_p = jnp.pad(k.astype(jnp.float32).reshape(1, -1), ((0, 0), (0, d_pad - in_dim)))
        b_p = jnp.pad(b.astype(jnp.float32).reshape(1, -1), ((0, 0), (0, d_pad - in_dim)))
        operands += [k_p, b_p]
        in_specs += [pl.BlockSpec((1, d_pad), lambda i: (0, 0), pipeline_mode=resident),
                     pl.BlockSpec((1, d_pad), lambda i: (0, 0), pipeline_mode=resident)]

    out_cols = d_pad + h_last_pad
    out_shape = jax.ShapeDtypeStruct((n_pad, out_cols), jnp.float32)
    out_specs = pl.BlockSpec((tile_n, out_cols), lambda i: (i, 0))

    # Explicit VMEM budget (default scoped limit is only 16/32 MiB).
    max_hid = max(hid_pad)
    vmem_needed = (4 * tile_n * (2 * d_pad + 2 * out_cols)     # pipelined I/O buffers
                   + 4 * tile_n * (3 * d_pad + 2 * max_hid)    # live f32 temporaries
                   + weight_bytes)
    vmem_limit = int(min(vmem_cap - (2 << 20),
                         max(32 << 20, int(vmem_needed * 1.5) + (4 << 20))))

    # Advisory cost estimate for XLA scheduling of the surrounding glue.
    flops = 0
    for li in range(len(hid_pad)):
        flops += 2 * n_pad * in_dims[li] * hid_pad[li]
    flops += len(cross_kernels) * 5 * n_pad * d_pad
    bytes_accessed = (int(x_p.size) * 4
                      + sum(int(o.size) * o.dtype.itemsize for o in operands[1:])
                      + n_pad * out_cols * 4)

    kernel = functools.partial(_dcn_kernel, len(dnn_weights), len(cross_kernels), d_pad)

    fused = pl.pallas_call(
        kernel,
        grid=(n_pad // tile_n,),
        out_shape=out_shape,
        in_specs=in_specs,
        out_specs=out_specs,
        compiler_params=pltpu.CompilerParams(
            dimension_semantics=("parallel",),        # both TCs on v7x; free elsewhere
            vmem_limit_bytes=vmem_limit),
        cost_estimate=pl.CostEstimate(flops=flops, transcendentals=0,
                                      bytes_accessed=bytes_accessed),
    )(*operands)

    if in_dim == d_pad:
        # Fused output already holds [cross | deep] contiguously: slice, no concat.
        return fused[:n_rows, : in_dim + h_last]
    # in_dim not lane-aligned (e.g. the tiny demo): drop the lane padding between
    # the two halves; still cheaper than the old separate-output concat path.
    return jnp.concatenate([fused[:n_rows, :in_dim],
                            fused[:n_rows, d_pad:d_pad + h_last]], axis=-1)


# -----------------------------------------------------------------------------
# Parameter construction + glue (embedding lookup / dense slices / concat)
# -----------------------------------------------------------------------------
def init_params(key, in_dim, hidden_units, cross_num, sparse_feats, init_std=1e-4,
                embed_init_std=1e-4):
    params = {}
    keys = jax.random.split(key, 4)

    dims = [in_dim] + list(hidden_units)
    dnn_w, dnn_b = [], []
    wk = jax.random.split(keys[0], len(hidden_units))
    bk = jax.random.split(keys[1], len(hidden_units))
    for i in range(len(hidden_units)):
        dnn_w.append(init_std * jax.random.normal(wk[i], (dims[i], dims[i + 1]), jnp.float32))
        bound = 1.0 / np.sqrt(dims[i])
        dnn_b.append(jax.random.uniform(bk[i], (dims[i + 1],), jnp.float32, -bound, bound))
    params["dnn_w"], params["dnn_b"] = dnn_w, dnn_b

    ck_keys = jax.random.split(keys[2], cross_num)
    xavier_std = np.sqrt(2.0 / (in_dim + 1))
    params["cross_k"] = [xavier_std * jax.random.normal(ck_keys[i], (in_dim, 1), jnp.float32)
                         for i in range(cross_num)]
    params["cross_b"] = [jnp.zeros((in_dim, 1), jnp.float32) for _ in range(cross_num)]

    ek = jax.random.split(keys[3], len(sparse_feats))
    params["embeddings"] = {
        feat.embedding_name: embed_init_std * jax.random.normal(
            ek[i], (feat.vocabulary_size, feat.embedding_dim), jnp.float32)
        for i, feat in enumerate(sparse_feats)
    }
    return params


def dcn_model_forward(X, params, sparse_feats, dense_feats, feature_index):
    """X: (B, W, f_raw) float32.  Returns (B*W, input_dim + hidden_units[-1])."""
    X2 = X.reshape(-1, X.shape[2])  # (B*W, f_raw)

    sparse_embs = []
    for feat in sparse_feats:
        lo, hi = feature_index[feat.name]
        idx = X2[:, lo:hi].astype(jnp.int32)
        emb = jnp.take(params["embeddings"][feat.embedding_name], idx, axis=0)
        sparse_embs.append(emb)
    sparse_dnn_input = jnp.concatenate(sparse_embs, axis=-1).reshape(X2.shape[0], -1)

    dense_vals = [X2[:, feature_index[f.name][0]:feature_index[f.name][1]] for f in dense_feats]
    dense_dnn_input = jnp.concatenate(dense_vals, axis=-1)

    dnn_input = jnp.concatenate(
        [sparse_dnn_input.astype(jnp.float32), dense_dnn_input.astype(jnp.float32)], axis=-1)

    return dcn_forward_pallas(dnn_input, params["dnn_w"], params["dnn_b"],
                              params["cross_k"], params["cross_b"])


# Pure-JAX f32 reference (mirrors the PyTorch math) for correctness checking.
def dcn_reference(dnn_input, params):
    h = dnn_input
    for w, b in zip(params["dnn_w"], params["dnn_b"]):
        h = jnp.maximum(h @ w + b, 0.0)
    x0 = dnn_input[:, :, None]
    xl = x0
    for k, b in zip(params["cross_k"], params["cross_b"]):
        xl_w = jnp.tensordot(xl, k, axes=([1], [0]))  # (N,1,1)
        xl = jnp.matmul(x0, xl_w) + b + xl
    cross_out = jnp.squeeze(xl, axis=2)
    return jnp.concatenate([cross_out, h], axis=-1)


# -----------------------------------------------------------------------------
if __name__ == "__main__":
    # Synthetic feature schema: 2 sparse features (1 idx col each), 1 dense (4 cols).
    sparse_feats = [SparseFeat("cat_a", vocabulary_size=10, embedding_dim=4),
                    SparseFeat("cat_b", vocabulary_size=8, embedding_dim=4)]
    dense_feats = [DenseFeat("dense_c", dimension=4)]
    feature_index = {"cat_a": (0, 1), "cat_b": (1, 2), "dense_c": (2, 6)}

    input_dim = sum(f.embedding_dim for f in sparse_feats) + sum(f.dimension for f in dense_feats)
    dnn_hidden_units = (32, 16)
    cross_num = 2

    B, W, f_raw = 2, 8, 6  # raw input: (B, W, f_raw)

    key = jax.random.PRNGKey(0)
    kx_a, kx_b, kx_d, kp = jax.random.split(key, 4)

    cat_a = jax.random.randint(kx_a, (B, W, 1), 0, 10).astype(jnp.float32)
    cat_b = jax.random.randint(kx_b, (B, W, 1), 0, 8).astype(jnp.float32)
    dense = jax.random.normal(kx_d, (B, W, 4), jnp.float32)
    X = jnp.concatenate([cat_a, cat_b, dense], axis=-1)  # (2, 8, 6)

    params = init_params(kp, input_dim, dnn_hidden_units, cross_num, sparse_feats)

    out = dcn_model_forward(X, params, sparse_feats, dense_feats, feature_index)
    out = jax.block_until_ready(out)

    # Correctness check against the pure-JAX f32 reference of the Pallas portion.
    X2 = X.reshape(-1, f_raw)
    emb_a = jnp.take(params["embeddings"]["cat_a"], X2[:, 0:1].astype(jnp.int32), axis=0)
    emb_b = jnp.take(params["embeddings"]["cat_b"], X2[:, 1:2].astype(jnp.int32), axis=0)
    dnn_input_ref = jnp.concatenate(
        [jnp.concatenate([emb_a, emb_b], axis=-1).reshape(X2.shape[0], -1), X2[:, 2:6]], axis=-1)
    ref = dcn_reference(dnn_input_ref, params)

    assert out.shape == (B * W, input_dim + dnn_hidden_units[-1]), out.shape
    # DNN tower uses bf16 matmul operands (f32 accumulate) -> loosened tolerance.
    assert np.allclose(np.asarray(out), np.asarray(ref), rtol=2e-2, atol=1e-4)
    print("KERNEL_OK")
</pallas_src>

<mosaic_0001>
module attributes {stable_mosaic.version = 11 : i64} {
  func.func @_dcn_kernel(%arg0: i32, %arg1: memref<8x128xf32, #tpu.memory_space<vmem>>, %arg2: memref<128x128xbf16, #tpu.memory_space<vmem>>, %arg3: memref<1x128xf32, #tpu.memory_space<vmem>>, %arg4: memref<128x128xbf16, #tpu.memory_space<vmem>>, %arg5: memref<1x128xf32, #tpu.memory_space<vmem>>, %arg6: memref<1x128xf32, #tpu.memory_space<vmem>>, %arg7: memref<1x128xf32, #tpu.memory_space<vmem>>, %arg8: memref<1x128xf32, #tpu.memory_space<vmem>>, %arg9: memref<1x128xf32, #tpu.memory_space<vmem>>, %arg10: memref<8x256xf32, #tpu.memory_space<vmem>>) attributes {dimension_semantics = [#tpu.dimension_semantics<parallel>], iteration_bounds = array<i64: 2>, scalar_prefetch = 0 : i64, scratch_operands = 0 : i64, tpu.core_type = #tpu.core_type<tc>, window_params = [{transform_indices = @transform_0, window_bounds = array<i64: 8, 128>}, {pipeline_mode = #tpu.pipeline_mode<synchronous>, transform_indices = @transform_1, window_bounds = array<i64: 128, 128>}, {pipeline_mode = #tpu.pipeline_mode<synchronous>, transform_indices = @transform_2, window_bounds = array<i64: 1, 128>}, {pipeline_mode = #tpu.pipeline_mode<synchronous>, transform_indices = @transform_3, window_bounds = array<i64: 128, 128>}, {pipeline_mode = #tpu.pipeline_mode<synchronous>, transform_indices = @transform_4, window_bounds = array<i64: 1, 128>}, {pipeline_mode = #tpu.pipeline_mode<synchronous>, transform_indices = @transform_5, window_bounds = array<i64: 1, 128>}, {pipeline_mode = #tpu.pipeline_mode<synchronous>, transform_indices = @transform_6, window_bounds = array<i64: 1, 128>}, {pipeline_mode = #tpu.pipeline_mode<synchronous>, transform_indices = @transform_7, window_bounds = array<i64: 1, 128>}, {pipeline_mode = #tpu.pipeline_mode<synchronous>, transform_indices = @transform_8, window_bounds = array<i64: 1, 128>}, {transform_indices = @transform_9, window_bounds = array<i64: 8, 256>}]} {
    %c0 = arith.constant 0 : index
    %c0_0 = arith.constant 0 : index
    %0 = vector.load %arg1[%c0, %c0_0] : memref<8x128xf32, #tpu.memory_space<vmem>>, vector<8x128xf32>
    %1 = arith.truncf %0 : vector<8x128xf32> to vector<8x128xbf16>
    %c0_1 = arith.constant 0 : index
    %c0_2 = arith.constant 0 : index
    %2 = vector.load %arg2[%c0_1, %c0_2] : memref<128x128xbf16, #tpu.memory_space<vmem>>, vector<128x128xbf16>
    %cst = arith.constant dense<0.000000e+00> : vector<8x128xf32>
    %3 = tpu.matmul %1, %2, %cst {dimension_numbers = #tpu.dot_dimension_numbers<[1], [0], [0], [1], [0, 0, 1, 1], [], []>} : vector<8x128xbf16>, vector<128x128xbf16>, vector<8x128xf32> -> vector<8x128xf32>
    %c0_3 = arith.constant 0 : index
    %c0_4 = arith.constant 0 : index
    %4 = vector.load %arg3[%c0_3, %c0_4] : memref<1x128xf32, #tpu.memory_space<vmem>>, vector<1x128xf32>
    %5 = vector.broadcast %4 : vector<1x128xf32> to vector<8x128xf32>
    %6 = arith.addf %3, %5 : vector<8x128xf32>
    %cst_5 = arith.constant 0.000000e+00 : f32
    %7 = vector.broadcast %cst_5 : f32 to vector<8x128xf32>
    %8 = arith.maximumf %6, %7 : vector<8x128xf32>
    %9 = arith.truncf %8 : vector<8x128xf32> to vector<8x128xbf16>
    %c0_6 = arith.constant 0 : index
    %c0_7 = arith.constant 0 : index
    %10 = vector.load %arg4[%c0_6, %c0_7] : memref<128x128xbf16, #tpu.memory_space<vmem>>, vector<128x128xbf16>
    %cst_8 = arith.constant dense<0.000000e+00> : vector<8x128xf32>
    %11 = tpu.matmul %9, %10, %cst_8 {dimension_numbers = #tpu.dot_dimension_numbers<[1], [0], [0], [1], [0, 0, 1, 1], [], []>} : vector<8x128xbf16>, vector<128x128xbf16>, vector<8x128xf32> -> vector<8x128xf32>
    %c0_9 = arith.constant 0 : index
    %c0_10 = arith.constant 0 : index
    %12 = vector.load %arg5[%c0_9, %c0_10] : memref<1x128xf32, #tpu.memory_space<vmem>>, vector<1x128xf32>
    %13 = vector.broadcast %12 : vector<1x128xf32> to vector<8x128xf32>
    %14 = arith.addf %11, %13 : vector<8x128xf32>
    %cst_11 = arith.constant 0.000000e+00 : f32
    %15 = vector.broadcast %cst_11 : f32 to vector<8x128xf32>
    %16 = arith.maximumf %14, %15 : vector<8x128xf32>
    %c0_12 = arith.constant 0 : index
    %c0_13 = arith.constant 0 : index
    %17 = vector.load %arg6[%c0_12, %c0_13] : memref<1x128xf32, #tpu.memory_space<vmem>>, vector<1x128xf32>
    %18 = vector.broadcast %17 : vector<1x128xf32> to vector<8x128xf32>
    %19 = arith.mulf %0, %18 : vector<8x128xf32>
    %cst_14 = arith.constant dense<0.000000e+00> : vector<8xf32>
    %20 = vector.multi_reduction <add>, %19, %cst_14 [1] : vector<8x128xf32> to vector<8xf32>
    %21 = vector.shape_cast %20 : vector<8xf32> to vector<8x1xf32>
    %22 = vector.broadcast %21 : vector<8x1xf32> to vector<8x128xf32>
    %23 = arith.mulf %0, %22 : vector<8x128xf32>
    %c0_15 = arith.constant 0 : index
    %c0_16 = arith.constant 0 : index
    %24 = vector.load %arg7[%c0_15, %c0_16] : memref<1x128xf32, #tpu.memory_space<vmem>>, vector<1x128xf32>
    %25 = vector.broadcast %24 : vector<1x128xf32> to vector<8x128xf32>
    %26 = arith.addf %23, %25 : vector<8x128xf32>
    %27 = arith.addf %26, %0 : vector<8x128xf32>
    %c0_17 = arith.constant 0 : index
    %c0_18 = arith.constant 0 : index
    %28 = vector.load %arg8[%c0_17, %c0_18] : memref<1x128xf32, #tpu.memory_space<vmem>>, vector<1x128xf32>
    %29 = vector.broadcast %28 : vector<1x128xf32> to vector<8x128xf32>
    %30 = arith.mulf %27, %29 : vector<8x128xf32>
    %cst_19 = arith.constant dense<0.000000e+00> : vector<8xf32>
    %31 = vector.multi_reduction <add>, %30, %cst_19 [1] : vector<8x128xf32> to vector<8xf32>
    %32 = vector.shape_cast %31 : vector<8xf32> to vector<8x1xf32>
    %33 = vector.broadcast %32 : vector<8x1xf32> to vector<8x128xf32>
    %34 = arith.mulf %0, %33 : vector<8x128xf32>
    %c0_20 = arith.constant 0 : index
    %c0_21 = arith.constant 0 : index
    %35 = vector.load %arg9[%c0_20, %c0_21] : memref<1x128xf32, #tpu.memory_space<vmem>>, vector<1x128xf32>
    %36 = vector.broadcast %35 : vector<1x128xf32> to vector<8x128xf32>
    %37 = arith.addf %34, %36 : vector<8x128xf32>
    %38 = arith.addf %37, %27 : vector<8x128xf32>
    %c0_22 = arith.constant 0 : index
    %c0_23 = arith.constant 0 : index
    %39 = vector.load %arg10[%c0_22, %c0_23] : memref<8x256xf32, #tpu.memory_space<vmem>>, vector<8x128xf32>
    tpu.vector_store %arg10[%c0_22, %c0_23], %38 {strides = array<i32>} : memref<8x256xf32, #tpu.memory_space<vmem>>, vector<8x128xf32>,
    %c0_24 = arith.constant 0 : index
    %c128 = arith.constant 128 : index
    %40 = vector.load %arg10[%c0_24, %c128] : memref<8x256xf32, #tpu.memory_space<vmem>>, vector<8x128xf32>
    tpu.vector_store %arg10[%c0_24, %c128], %16 {strides = array<i32>} : memref<8x256xf32, #tpu.memory_space<vmem>>, vector<8x128xf32>,
    return
  }
  func.func @transform_0(%arg0: i32) -> (i32, i32) {
    %c0_i32 = arith.constant 0 : i32
    %c0_i32_0 = arith.constant 0 : i32
    return %arg0, %c0_i32 : i32, i32
  }
  func.func @transform_1(%arg0: i32) -> (i32, i32) {
    %c0_i32 = arith.constant 0 : i32
    %c0_i32_0 = arith.constant 0 : i32
    %c0_i32_1 = arith.constant 0 : i32
    return %c0_i32, %c0_i32_0 : i32, i32
  }
  func.func @transform_2(%arg0: i32) -> (i32, i32) {
    %c0_i32 = arith.constant 0 : i32
    %c0_i32_0 = arith.constant 0 : i32
    %c0_i32_1 = arith.constant 0 : i32
    return %c0_i32, %c0_i32_0 : i32, i32
  }
  func.func @transform_3(%arg0: i32) -> (i32, i32) {
    %c0_i32 = arith.constant 0 : i32
    %c0_i32_0 = arith.constant 0 : i32
    %c0_i32_1 = arith.constant 0 : i32
    return %c0_i32, %c0_i32_0 : i32, i32
  }
  func.func @transform_4(%arg0: i32) -> (i32, i32) {
    %c0_i32 = arith.constant 0 : i32
    %c0_i32_0 = arith.constant 0 : i32
    %c0_i32_1 = arith.constant 0 : i32
    return %c0_i32, %c0_i32_0 : i32, i32
  }
  func.func @transform_5(%arg0: i32) -> (i32, i32) {
    %c0_i32 = arith.constant 0 : i32
    %c0_i32_0 = arith.constant 0 : i32
    %c0_i32_1 = arith.constant 0 : i32
    return %c0_i32, %c0_i32_0 : i32, i32
  }
  func.func @transform_6(%arg0: i32) -> (i32, i32) {
    %c0_i32 = arith.constant 0 : i32
    %c0_i32_0 = arith.constant 0 : i32
    %c0_i32_1 = arith.constant 0 : i32
    return %c0_i32, %c0_i32_0 : i32, i32
  }
  func.func @transform_7(%arg0: i32) -> (i32, i32) {
    %c0_i32 = arith.constant 0 : i32
    %c0_i32_0 = arith.constant 0 : i32
    %c0_i32_1 = arith.constant 0 : i32
    return %c0_i32, %c0_i32_0 : i32, i32
  }
  func.func @transform_8(%arg0: i32) -> (i32, i32) {
    %c0_i32 = arith.constant 0 : i32
    %c0_i32_0 = arith.constant 0 : i32
    %c0_i32_1 = arith.constant 0 : i32
    return %c0_i32, %c0_i32_0 : i32, i32
  }
  func.func @transform_9(%arg0: i32) -> (i32, i32) {
    %c0_i32 = arith.constant 0 : i32
    %c0_i32_0 = arith.constant 0 : i32
    return %arg0, %c0_i32 : i32, i32
  }
}

</mosaic_0001>

<bundles_post_ra>
// kernel: tpu_custom_call.1
= control target key start
LH: loop header
LB: loop body
LE: loop exit
PB: predicated region body
PF: predicated region fallthrough
CT: control target
= control target key end

     0   :  { %s1348_s0 = inlined_call_operand.hbm [shape: f32[16,128], index: 0, kind: input, shape index: {}]   ;;  %s1349_s1 = inlined_call_operand.hbm [shape: bf16[128,128], index: 1, kind: input, shape index: {}]   ;;  %s1350_s2 = inlined_call_operand.vmem [shape: f32[1,128], index: 2, kind: input, shape index: {}]   ;;  %s1351_s3 = inlined_call_operand.hbm [shape: bf16[128,128], index: 3, kind: input, shape index: {}]   ;;  %s1352_s4 = inlined_call_operand.vmem [shape: f32[1,128], index: 4, kind: input, shape index: {}]   ;;  %s1353_s5 = inlined_call_operand.vmem [shape: f32[1,128], index: 5, kind: input, shape index: {}]   ;;  %s1354_s6 = inlined_call_operand.vmem [shape: f32[1,128], index: 6, kind: input, shape index: {}]   ;;  %s1355_s7 = inlined_call_operand.vmem [shape: f32[1,128], index: 7, kind: input, shape index: {}]   ;;  %s1356_s8 = inlined_call_operand.vmem [shape: f32[1,128], index: 8, kind: input, shape index: {}]   ;;  %s1357_s9 = inlined_call_operand.hbm [shape: f32[16,256], index: 9, kind: output, shape index: {}]  }
   0x1   :  { %1363 = sst [smem:[#allocation14_spill]] %s1349_s1 }
   0x2   :  { %1364 = sst [smem:[#allocation15_spill]] %s1351_s3 }
   0x3   :  { %14 = vsyncpa [#allocation3], 0 }
   0x4   :  { %16 = vsyncpa [#allocation3 + $0x1], 0 }
   0x5   :  { %17 = vsyncpa [#allocation6], 0 }
   0x6   :  { %18 = vsyncpa [#allocation4], 0 }
   0x7   :  { %20 = vsyncpa [#allocation4 + $0x1], 0  ;;  %s1144_s30 = smov 0   ;;  %s1146_s10 = smov 0  }
   0x8   :  { %s1148_s11 = smov 0   ;;  %s1150_s12 = smov 0  }
   0x9 LB: > { %1365 = sst [smem:[#allocation12_spill]] %s1080_s11  ;;  %s1165_s13 = sadd.s32 4294967295, %s1084_s12   ;;  %s1084_s12 = sphi %s1150_s12, %s1387_s12   ;;  %s1080_s11 = sphi %s1148_s11, %s1384_s11   ;;  %s1076_s10 = sphi %s1146_s10, %s1386_s10   ;;  %s1072_s30 = sphi %s1144_s30, %s1385_s30  }
   0xa   : > { %s751_s14 = sadd.s32 4294967294, %s1084_s12   ;;  %p46_p0 = scmp.ne.s32.totalorder %s1076_s10, %s1072_s30 }
   0xb   : > { %p1358_p1 = scmp.eq.s32.totalorder %s1165_s13, 0  ;;  %p244_p3 = scmp.eq.s32.totalorder %s751_s14, 1 }
   0xc   : > { %p752_p5 = scmp.ge.s32.totalorder %s1084_s12, 1  ;;  %p251_p7 = scmp.lt.s32.totalorder %s1084_s12, 3 }
   0xd   : > { %p1174_p4 = por %p1358_p1, %p46_p0  ;;  %p1179_p6 = por %p244_p3, %p46_p0 }
   0xe   : > { %p1184_p8 = pnand %p752_p5, %p251_p7  ;;  %s1086_s18 = smov [#allocation5]  }
   0xf   : > { %s1366_s15 = scalar_select %p1174_p4, 1, 0 }
  0x10   : > { %s1367_s16 = scalar_select %p1179_p6, 1, 0 }
  0x11   : > { %s1368_s17 = scalar_select %p1184_p8, 1, 0 }
  0x12   : > { %s263_s19 = sshll.u32 %s1086_s18, 4  ;;  %p861_p9 = pneg %p1184_p8  ;;  %s264_s19 = int_to_ptr.vmem [resolvable:$true] %s263_s19 }
  0x13   : > { %s1087_s21 = smov [#allocation7]   ;;  %s947_s23 = scalar_lea.vmem %s264_s19, 1024 }
  0x14   : > { %p1193_p11 = pnand %p861_p9, %p1358_p1  ;;  %s279_s22 = sshll.u32 %s1087_s21, 4  ;;  %s280_s22 = int_to_ptr.vmem [resolvable:$true] %s279_s22 }
  0x15   : > { %p948_p13 = scmp.ne.s32.totalorder %s264_s19, %s947_s23  ;;  %p955_p5 = scmp.lt.s32.totalorder %s264_s19, %s264_s19 }
  0x16   : > { %p938_p12 = pneg %p1193_p11  ;;  %p956_p7 = scmp.lt.s32.totalorder %s947_s23, %s947_s23 }
  0x18   : > { %p950_p0 = pnand %p948_p13, %p938_p12  ;;  %p957_p10 = por %p956_p7, %p955_p5 }
  0x1a   : > { %p951_p3 = pneg %p950_p0 }
  0x1c   : > { %p958_p9 = pnand %p957_p10, %p951_p3 }
  0x1e   : > { %961 = shalt.err (!%p958_p9)
}
  0x1f   : > { %s1088_s24 = smov 64   ;;  %s1089_s25 = smov 4  }
  0x20   : > { %s1370_s1 = sld [smem:[#allocation14_spill]]  ;;  %s973_s28 = scalar_lea.vmem %s280_s22, 1024 }
  0x21   : > { %p974_p1 = scmp.ne.s32.totalorder %s280_s22, %s973_s28  ;;  %p981_p2 = scmp.lt.s32.totalorder %s280_s22, %s280_s22 }
  0x22   : > { %p982_p6 = scmp.lt.s32.totalorder %s973_s28, %s973_s28 }
  0x23   : > { %p976_p13 = pnand %p974_p1, %p938_p12 }
  0x24   : > { %p983_p5 = por %p982_p6, %p981_p2 }
  0x25   : > { %p977_p0 = pneg %p976_p13 }
  0x26   : > { %864 = dma.hbm_to_vmem [thread:$0]  (!%p1193_p11), %s1370_s1, 1024, %s264_s19, [#allocation6], %s1088_s24, %s1088_s24, %s1089_s25  }
  0x27   : > { %p984_p10 = pnand %p983_p5, %p977_p0 }
  0x29   : > { %987 = shalt.err (!%p984_p10)
}
  0x2a   : > { %s1371_s3 = sld [smem:[#allocation15_spill]]  ;;  %s1216_s18 = sadd.s32 1, %s1084_s12  }
  0x2b   : > { %s33_s19 = sadd.s32 1, %s1080_s11  ;;  %s30_s20 = ssub.s32 %s1084_s12, %s1216_s18 }
  0x2c   : > { %p40_p1 = scmp.ne.s32.totalorder %s1080_s11, %s1076_s10  ;;  %p31_p2 = scmp.eq.s32.totalorder %s30_s20, 0 }
  0x2d   : > { %p41_p6 = scmp.eq.s32.totalorder %s1084_s12, 0  ;;  %p1372_p12 = scmp.eq.s32.totalorder %s1165_s13, 1 }
  0x2e   : > { %p878_p7 = scmp.lt.s32.totalorder %s1084_s12, 2  ;;  %s308_s26 = sand.u32 1, %s1080_s11  }
  0x2f   : > { %p1226_p3 = por %p1372_p12, %p40_p1  ;;  %p42_p9 = por %p41_p6, %p40_p1 }
  0x30   : > { %867 = dma.hbm_to_vmem [thread:$0]  (!%p1193_p11), %s1371_s3, 1024, %s280_s22, [#allocation6], %s1088_s24, %s1088_s24, %s1089_s25  }
  0x31   : > { %s1373_s21 = scalar_select %p1226_p3, 1, 0 }
  0x32   : > { %s1232_s23 = scalar_select %p31_p2, %s1080_s11, %s33_s19  }
  0x33   : > { %s756_s27 = sshll.u32 %s308_s26, 3  ;;  %s757_s22 = sshll.u32 %s1084_s12, 7 }
  0x34   : > { %1374 = sst [smem:[#allocation13_spill]] %s1232_s23  ;;  %s1239_s28 = scalar_lea.hbm %s1348_s0, %s757_s22 }
  0x35   : > { %s312_s29 = scalar_lea.vmem [#allocation2], %s756_s27  ;;  %p1241_p11 = pnand %p878_p7, %p42_p9 }
  0x36   : > { %s319_s14 = sshll.u32 %s312_s29, 4  ;;  %s309_s19 = scalar_lea.sflag [#allocation3], %s308_s26  ;;  %s320_s14 = int_to_ptr.vmem [resolvable:$true] %s319_s14 }
  0x37   : > { %s988_s1 = scalar_lea.hbm %s1239_s28, 128  ;;  %p990_p0 = pneg %p1241_p11 }
  0x38   : > { %p989_p13 = scmp.ne.s32.totalorder %s1239_s28, %s988_s1  ;;  %s993_s25 = scalar_lea.hbm %s1348_s0, 256 }
  0x39   : > { %p994_p1 = scmp.lt.s32.totalorder %s1239_s28, %s1348_s0  ;;  %p995_p2 = scmp.lt.s32.totalorder %s993_s25, %s988_s1 }
  0x3a   : > { %p991_p5 = pnand %p990_p0, %p989_p13 }
  0x3b   : > { %p996_p6 = por %p995_p2, %p994_p1 }
  0x3c   : > { %p992_p10 = pneg %p991_p5 }
  0x3e   : > { %p997_p12 = pnand %p996_p6, %p992_p10 }
  0x40   : > { %1000 = shalt.err (!%p997_p12)
}
  0x41   : > { %s1001_s29 = scalar_lea.vmem %s320_s14, 128  ;;  %s1090_s26 = smov [#allocation2]  }
  0x42   : > { %p1002_p7 = scmp.ne.s32.totalorder %s320_s14, %s1001_s29  ;;  %s1006_s23 = sshll.u32 %s1090_s26, 4  ;;  %s1007_s23 = int_to_ptr.vmem [resolvable:$false] %s1006_s23 }
  0x43   : > { %s1008_s11 = scalar_lea.vmem %s1007_s23, 256  ;;  %p1009_p13 = scmp.lt.s32.totalorder %s320_s14, %s1007_s23 }
  0x44   : > { %p1004_p9 = pnand %p1002_p7, %p990_p0  ;;  %p1010_p5 = scmp.lt.s32.totalorder %s1008_s11, %s1001_s29 }
  0x46   : > { %p1005_p3 = pneg %p1004_p9  ;;  %p1011_p4 = por %p1010_p5, %p1009_p13 }
  0x48   : > { %p1012_p8 = pnand %p1011_p4, %p1005_p3 }
  0x4a   : > { %1015 = shalt.err (!%p1012_p8)
}
  0x4b   : > { %871 = dma.hbm_to_vmem [thread:$0]  (!%p1241_p11), %s1239_s28, 128, %s320_s14, %s309_s19  }
  0x4c   : > { %p1376_p10 = scmp.ne.s32.totalorder %s1368_s17, 0 }
  0x4d   : > { %s1262_s1 = sand.u32 (!%p1376_p10), 1, %s1076_s10   ;;  %p1377_p0 = scmp.ne.s32.totalorder (!%p1376_p10), %s1366_s15, 0 }
  0x4e   : > { %328 = sbr.rel (%p1376_p10) target bundleno = 531 (0x213), region = 56  ;;  %s759_s3 = sshll.u32 (!%p1376_p10), %s1262_s1, 3 }
  0x4f   : > { %s331_s22 = scalar_lea.sflag (!%p1376_p10), [#allocation3], %s1262_s1  ;;  %s334_s23 = scalar_lea.vmem (!%p1376_p10), [#allocation2], %s759_s3 }
  0x53   : > { %1059 = dma.done.wait (%p1377_p0), %s331_s22, 128  }
  0x54   : > { %1061 = vsyncadd (%p1377_p0), %s331_s22, 4294967168  ;;  %p1378_p4 = scmp.eq.s32.totalorder %s1165_s13, 0 }
  0x56   : > { %1063 = dma.done.wait (%p1378_p4), [#allocation6], 2048   ;;  %p1379_p8 = pmov %p1378_p4 }
  0x57   : > { %v1091_v0 = vmov 0.0   ;;  %vm1092_vm0 = vmmov 0   ;;  %v920_v1 = vld [vmem:[#allocation5 + $0x38] sm:$0xff]   ;;  %v781_v3 = vld [vmem:[%s1353_s5] ss:$0 sm:$0xff]  ;;  %v922_v6 = vld [vmem:[#allocation5 + $0x28] sm:$0xff]  }
  0x58   : > { %1065 = vsyncadd (%p1379_p8), [#allocation6], 4294965248  ;;  %809 = vmatprep.subr.bf16.mxu0 %v1091_v0  ;;  %825 = vmatprep.mubr.msk.bf16.mxu0 %vm1092_vm0, %v1091_v0  ;;  %v1274_v2 = vld [vmem:[%s334_s23] sm:$0xff]  ;;  %v923_v7 = vld [vmem:[#allocation5 + $0x20] sm:$0xff]   ;;  %s762_s29 = sshll.u32 %s1262_s1, 4  ;;  %s790_s23 = sshll.u32 %s1165_s13, 8 }
  0x59   : > { %829 = vmatprep.subr.bf16.mxu1 %v1091_v0  ;;  %845 = vmatprep.mubr.msk.bf16.mxu1 %vm1092_vm0, %v1091_v0  ;;  %v612_v4 = vmul.f32 %v781_v3, %v1274_v2  ;;  %v921_v5 = vld [vmem:[#allocation5 + $0x30] sm:$0xff]   ;;  %v924_v8 = vld [vmem:[#allocation5 + $0x18] sm:$0xff]   ;;  %v926_v10 = vld [vmem:[#allocation5 + $0x8] sm:$0xff]   ;;  %v379_v15 = vpack.c.bf16 %v1274_v2, %v1274_v2  ;;  %s376_s26 = scalar_lea.vmem [#allocation8], %s762_s29  ;;  %s1305_s28 = scalar_lea.hbm %s1357_s9, %s790_s23 }
  0x5a   : > { %810 = vmatpush3.bf16.msra.mxu0 %v920_v1  ;;  %v925_v9 = vld [vmem:[#allocation5 + $0x10] sm:$0xff]   ;;  %v928_v11 = vld [vmem:[#allocation7 + $0x38] sm:$0xff]   ;;  %v927_v13 = vld [vmem:[#allocation5] sm:$0xff]   ;;  %s662_s11 = sshll.u32 %s376_s26, 4  ;;  %s648_s14 = scalar_lea.sflag [#allocation4], %s1262_s1  ;;  %s1307_s11 = int_to_ptr.vmem [resolvable:$true] %s662_s11 }
  0x5b   : > { %811 = vmatprep.subr.bf16.mxu0 %v1091_v0  ;;  %613 = vadd.xlane.f32.xlu0 %v612_v4  ;;  %v929_v12 = vld [vmem:[#allocation7 + $0x30] sm:$0xff]   ;;  %v930_v14 = vld [vmem:[#allocation7 + $0x28] sm:$0xff]   ;;  %v931_v16 = vld [vmem:[#allocation7 + $0x20] sm:$0xff]   ;;  %s1016_s20 = scalar_lea.vmem %s1307_s11, 256  ;;  %p1380_p11 = scmp.ne.s32.totalorder %s1373_s21, 0 }
  0x5c   : > { %830 = vmatpush3.bf16.msra.mxu1 %v928_v11  ;;  %v932_v17 = vld [vmem:[#allocation7 + $0x18] sm:$0xff]   ;;  %v933_v18 = vld [vmem:[#allocation7 + $0x10] sm:$0xff]   ;;  %v934_v19 = vld [vmem:[#allocation7 + $0x8] sm:$0xff]   ;;  %p1017_p3 = scmp.ne.s32.totalorder %s1307_s11, %s1016_s20  ;;  %s1093_s13 = smov [#allocation8]  }
  0x5d   : > { %831 = vmatprep.subr.bf16.mxu1 %v1091_v0  ;;  %v935_v20 = vld [vmem:[#allocation7] sm:$0xff]   ;;  %v782_v21 = vld [vmem:[%s1354_s6] ss:$0 sm:$0xff]  ;;  %s1020_s19 = sshll.u32 %s1093_s13, 4  ;;  %s1021_s19 = int_to_ptr.vmem [resolvable:$false] %s1020_s19 }
  0x5e   : > { %812 = vmatpush3.bf16.msra.mxu0 %v921_v5  ;;  %v783_v25 = vld [vmem:[%s1355_s7] ss:$0 sm:$0xff]  ;;  %p1018_p1 = pnand %p1017_p3, %p1380_p11  ;;  %s1022_s24 = scalar_lea.vmem %s1021_s19, 512 }
  0x5f   : > { %813 = vmatprep.subr.bf16.mxu0 %v1091_v0  ;;  %v763_v28 = vld [vmem:[%s1350_s2] ss:$0 sm:$0xff]  ;;  %p1023_p6 = scmp.lt.s32.totalorder %s1307_s11, %s1021_s19  ;;  %p1024_p12 = scmp.lt.s32.totalorder %s1022_s24, %s1016_s20 }
  0x60   : > { %832 = vmatpush3.bf16.msra.mxu1 %v929_v12  ;;  %v784_v36 = vld [vmem:[%s1356_s8] ss:$0 sm:$0xff]  ;;  %p1019_p2 = pneg %p1018_p1 }
  0x61   : > { %833 = vmatprep.subr.bf16.mxu1 %v1091_v0  ;;  %v772_v41 = vld [vmem:[%s1352_s4] ss:$0 sm:$0xff]  ;;  %p1025_p7 = por %p1024_p12, %p1023_p6 }
  0x62   : > { %814 = vmatpush3.bf16.msra.mxu0 %v922_v6 }
  0x63   : > { %815 = vmatprep.subr.bf16.mxu0 %v1091_v0  ;;  %p1026_p9 = pnand %p1025_p7, %p1019_p2 }
  0x64   : > { %834 = vmatpush3.bf16.msra.mxu1 %v930_v14 }
  0x65   : > { %835 = vmatprep.subr.bf16.mxu1 %v1091_v0 }
  0x66   : > { %816 = vmatpush3.bf16.msra.mxu0 %v923_v7 }
  0x67   : > { %817 = vmatprep.subr.bf16.mxu0 %v1091_v0 }
  0x68   : > { %836 = vmatpush3.bf16.msra.mxu1 %v931_v16 }
  0x69   : > { %837 = vmatprep.subr.bf16.mxu1 %v1091_v0 }
  0x6a   : > { %818 = vmatpush3.bf16.msra.mxu0 %v924_v8 }
  0x6b   : > { %819 = vmatprep.subr.bf16.mxu0 %v1091_v0 }
  0x6c   : > { %838 = vmatpush3.bf16.msra.mxu1 %v932_v17 }
  0x6d   : > { %839 = vmatprep.subr.bf16.mxu1 %v1091_v0 }
  0x6e   : > { %820 = vmatpush3.bf16.msra.mxu0 %v925_v9 }
  0x6f   : > { %821 = vmatprep.subr.bf16.mxu0 %v1091_v0 }
  0x70   : > { %840 = vmatpush3.bf16.msra.mxu1 %v933_v18 }
  0x71   : > { %841 = vmatprep.subr.bf16.mxu1 %v1091_v0 }
  0x72   : > { %822 = vmatpush3.bf16.msra.mxu0 %v926_v10 }
  0x73   : > { %823 = vmatprep.subr.bf16.mxu0 %v1091_v0 }
  0x74   : > { %842 = vmatpush3.bf16.msra.mxu1 %v934_v19 }
  0x75   : > { %843 = vmatprep.subr.bf16.mxu1 %v1091_v0 }
  0x76   : > { %824 = vmatpush3.bf16.msra.mxu0 %v927_v13 }
  0x78   : > { %844 = vmatpush3.bf16.msra.mxu1 %v935_v20 }
  0x79   : > { %826 = vmatmul.mubr.bf16.vlgmr.msra.gmra.mxu0 %v379_v15 }
  0xe4   : > { %v614_v22 = vpop.xlane.xlu0 %613 }
  0xe5   : > { %v615_v23 = vmul.f32 %v614_v22, %v1274_v2 }
  0xe7   : > { %v623_v24 = vadd.f32 %v782_v21, %v615_v23 }
  0xe9   : > { %v624_v26 = vadd.f32 %v623_v24, %v1274_v2 }
  0xeb   : > { %v632_v27 = vmul.f32 %v783_v25, %v624_v26 }
  0xed   : > { %633 = vadd.xlane.f32.xlu0 %v632_v27 }
 0x139   : > { %v485_v29 = vpop.f32.mrf.mxu0 }
 0x13a   : > { %v486_v30 = vadd.f32 %v763_v28, %v485_v29 }
 0x13b   : > { %v827_v31 = vpop.f32.mrf.mxu0 }
 0x13c   : > { %v491_v32 = vmax.f32 %v486_v30, 0.0 }
 0x13d   : > { %v488_v33 = vpop.f32.mrf.mxu0 }
 0x13e   : > { %v492_v34 = vpack.c.bf16 %v491_v32, %v491_v32 }
 0x13f   : > { %v828_v35 = vpop.f32.mrf.mxu0 }
 0x140   : > { %846 = vmatmul.mubr.bf16.vlgmr.msra.gmra.mxu1 %v492_v34 }
 0x176   : > { %v634_v37 = vpop.xlane.xlu0 %633 }
 0x177   : > { %v635_v38 = vmul.f32 %v634_v37, %v1274_v2 }
 0x179   : > { %v643_v39 = vadd.f32 %v784_v36, %v635_v38 }
 0x17b   : > { %v644_v40 = vadd.f32 %v643_v39, %v624_v26 }
 0x17d   : > { %645 = vst [vmem:[%s376_s26] sm:$0xff] %v644_v40 }
 0x200   : > { %v598_v42 = vpop.f32.mrf.mxu1 }
 0x201   : > { %v599_v43 = vadd.f32 %v772_v41, %v598_v42 }
 0x202   : > { %v847_v44 = vpop.f32.mrf.mxu1 }
 0x203   : > { %v604_v45 = vmax.f32 %v599_v43, 0.0 }
 0x204   : > { %v601_v46 = vpop.f32.mrf.mxu1 }
 0x205   : > { %646 = vst [vmem:[%s376_s26 + $0x8] sm:$0xff] %v604_v45 }
 0x206   : > { %v848_v47 = vpop.f32.mrf.mxu1 }
 0x207   : > { %1029 = shalt.err (!%p1026_p9)
}
 0x208   : > { %s1030_s25 = scalar_lea.hbm %s1305_s28, 256  ;;  %s1034_s29 = scalar_lea.hbm %s1357_s9, 512 }
 0x209   : > { %p1031_p13 = scmp.ne.s32.totalorder %s1305_s28, %s1030_s25  ;;  %p1035_p0 = scmp.lt.s32.totalorder %s1305_s28, %s1357_s9 }
 0x20a   : > { %p1036_p4 = scmp.lt.s32.totalorder %s1034_s29, %s1030_s25 }
 0x20b   : > { %p1032_p5 = pnand %p1031_p13, %p1380_p11 }
 0x20c   : > { %p1037_p8 = por %p1036_p4, %p1035_p0 }
 0x20d   : > { %p1033_p10 = pneg %p1032_p5 }
 0x20f   : > { %p1038_p3 = pnand %p1037_p8, %p1033_p10 }
 0x211   : > { %1041 = shalt.err (!%p1038_p3)
}
 0x212   : > { %859 = dma.vmem_to_hbm [thread:$0]  (%p1380_p11), %s1307_s11, 256, %s1305_s28, %s648_s14  }
 0x213 PF: > { %s674_s22 = sand.u32 1, %s1072_s30   ;;  %p1381_p1 = scmp.ne.s32.totalorder %s1367_s16, 0 }
 0x214   : > { %p1382_p2 = scmp.ge.s32.totalorder %s1084_s12, 2  ;;  %s675_s23 = scalar_lea.sflag [#allocation4], %s674_s22 }
 0x216   : > { %p873_p6 = pnand %p1382_p2, %p1381_p1 }
 0x218   : > { %p874_p12 = pneg %p873_p6 }
 0x21a   : > { %1067 = dma.done.wait (%p874_p12), %s675_s23, 256  }
 0x21b   : > { %1069 = vsyncadd (%p874_p12), %s675_s23, 4294967040  ;;  %s1383_s17 = sld [smem:[#allocation12_spill]]  ;;  %p23_p7 = scmp.ge.s32.totalorder %s1216_s18, 4  }
 0x21c   : > { %s1384_s11 = sld [smem:[#allocation13_spill]]  ;;  %s1385_s30 = smov %s1076_s10 }
 0x21d   : > { %s1387_s12 = smov %s1216_s18  ;;  %25 = sbr.rel (!%p23_p7) target bundleno = 9 (0x9), region = 109 }
 0x221   : > { %s1386_s10 = smov %s1383_s17 }
 0x222   :  { %680 = vsyncpa [#allocation3], 1 }
 0x223   :  { %682 = vsyncpa [#allocation3 + $0x1], 1 }
 0x224   :  { %683 = vsyncpa [#allocation6], 1 }
 0x225   :  { %684 = vsyncpa [#allocation4], 1 }
 0x226   :  { %686 = vsyncpa [#allocation4 + $0x1], 1 }

</bundles_post_ra>
